<compile_context>
chip_gen: v7x
topology: tpu7x:2x2x1
jax: 0.10.0
libtpu: 0.0.40
codegen_flags: <defaults>
</compile_context>

<pallas_src>
import functools

import jax
import jax.numpy as jnp
from jax.experimental import pallas as pl
from jax.experimental.pallas import tpu as pltpu


_LANE = 128                              # vreg lane width
_TARGET = 512                            # preferred tile side (multiple of 128)
_TILE_BUDGET_BYTES = 2 * 1024 * 1024     # per-operand tile budget


def _permute_kernel(x_ref, o_ref, *, perm):
    # Tile axes of x_ref are in *input* order; transposing by `perm` puts them
    # in output order.  Pure data movement, no in-kernel reshapes.
    o_ref[...] = jnp.transpose(x_ref[...], perm)


def _axis_block(ext, align, want):
    """Largest legal block size <= want for an axis of extent `ext`.

    Legal = the full extent, or a positive multiple of `align`.
    """
    want = max(1, want)
    if ext <= want:
        return ext                       # full extent is always legal
    blk = (want // align) * align
    if blk < align:
        blk = min(ext, align)            # smallest legal block
    return blk


def pallas_permute(x, dim0, dim1, dim2):
    """torch.Tensor.permute(dim0, dim1, dim2) for a 3-D array, as a Pallas kernel."""
    assert x.ndim == 3
    perm = (dim0, dim1, dim2)
    assert sorted(perm) == [0, 1, 2]

    if perm == (0, 1, 2):                # identity permute: nothing to move
        return x

    S = x.shape
    out_shape = tuple(S[p] for p in perm)
    itemsize = jnp.dtype(x.dtype).itemsize
    sublane = max(8, 32 // itemsize)     # 8 f32 / 16 bf16 / 32 int8

    # inv[a] = output axis that input axis `a` maps to.
    inv = [0, 0, 0]
    for j, p in enumerate(perm):
        inv[p] = j
    inv = tuple(inv)

    # Alignment required along each *output* axis j.  The block simultaneously
    # tiles output axis j and input axis perm[j]; it must satisfy the
    # (sublane, 128) rule for whichever view places it in the last two dims.
    # 128 is a multiple of every sublane pack, so lane-constrained axes use 128.
    aligns = []
    for j in range(3):
        lane_c = (j == 2) or (perm[j] == 2)
        sub_c = (j == 1) or (perm[j] == 1)
        aligns.append(_LANE if lane_c else (sublane if sub_c else 1))

    # Block sizes in output-axis order, assigned last-axis-first so stores stay
    # lane-dense, under a fixed per-tile VMEM budget (reserving at least the
    # minimal legal block for the axes not yet assigned).
    budget = max(1, _TILE_BUDGET_BYTES // itemsize)
    min_blk = [min(out_shape[j], aligns[j]) for j in range(3)]

    b = [1, 1, 1]
    b[2] = _axis_block(out_shape[2], aligns[2],
                       min(_TARGET, budget // max(1, min_blk[0] * min_blk[1])))
    b[1] = _axis_block(out_shape[1], aligns[1],
                       min(_TARGET, budget // max(1, min_blk[0] * b[2])))
    b[0] = _axis_block(out_shape[0], aligns[0],
                       budget // max(1, b[1] * b[2]))
    b = tuple(b)

    grid = tuple(pl.cdiv(out_shape[j], b[j]) for j in range(3))

    # Input block: along input axis a, block size / grid index come from the
    # output axis inv[a] (Pallas masks ragged-edge reads/writes consistently,
    # so non-divisible extents are safe).
    in_block = tuple(b[inv[a]] for a in range(3))

    def in_index(i0, i1, i2):
        idx = (i0, i1, i2)
        return tuple(idx[inv[a]] for a in range(3))

    def out_index(i0, i1, i2):
        return (i0, i1, i2)

    tile_bytes = b[0] * b[1] * b[2] * itemsize
    # in + out tiles, double-buffered, with headroom; clamped so it is safe on
    # every TPU generation (v5e 16 MiB scoped default .. v7x 64 MiB physical).
    vmem_limit = int(min(32 * 1024 * 1024,
                         max(16 * 1024 * 1024, 8 * tile_bytes)))

    kernel = functools.partial(_permute_kernel, perm=perm)

    return pl.pallas_call(
        kernel,
        out_shape=jax.ShapeDtypeStruct(out_shape, x.dtype),
        grid=grid,
        in_specs=[pl.BlockSpec(in_block, in_index)],
        out_specs=pl.BlockSpec(b, out_index),
        compiler_params=pltpu.CompilerParams(
            dimension_semantics=("parallel", "parallel", "arbitrary"),
            vmem_limit_bytes=vmem_limit,
        ),
        cost_estimate=pl.CostEstimate(
            flops=0,
            transcendentals=0,
            bytes_accessed=2 * x.size * itemsize,
        ),
    )(x)


class NNPermute:
    """Mirror of the PyTorch nnPermute module's forward pass."""

    def __init__(self, dim0, dim1, dim2):
        self.dims = (dim0, dim1, dim2)

    def __call__(self, x):
        return pallas_permute(x, *self.dims)


if __name__ == "__main__":
    # The TCN usage: nnPermute(0, 2, 1) applied to a (B, C, L) tensor.
    B, C, L = 2, 4, 16
    key = jax.random.PRNGKey(0)
    x = jax.random.normal(key, (B, C, L), dtype=jnp.float32)

    mod = NNPermute(0, 2, 1)
    out = jax.block_until_ready(mod(x))
    ref = jnp.transpose(x, (0, 2, 1))
    assert out.shape == ref.shape, (out.shape, ref.shape)
    assert out.dtype == ref.dtype
    assert jnp.array_equal(out, ref), "permute(0, 2, 1) mismatch"

    # Identity permute short-circuits (a view in PyTorch, pass-through here).
    out_id = jax.block_until_ready(NNPermute(0, 1, 2)(x))
    assert jnp.array_equal(out_id, x)

    print("KERNEL_OK")
</pallas_src>

<mosaic_0001>
module attributes {stable_mosaic.version = 11 : i64} {
  func.func @_permute_kernel(%arg0: i32, %arg1: i32, %arg2: i32, %arg3: memref<2x4x16xf32, #tpu.memory_space<vmem>>, %arg4: memref<2x16x4xf32, #tpu.memory_space<vmem>>) attributes {dimension_semantics = [#tpu.dimension_semantics<parallel>, #tpu.dimension_semantics<parallel>, #tpu.dimension_semantics<arbitrary>], iteration_bounds = array<i64: 1, 1, 1>, scalar_prefetch = 0 : i64, scratch_operands = 0 : i64, tpu.core_type = #tpu.core_type<tc>, window_params = [{transform_indices = @transform_0, window_bounds = array<i64: 2, 4, 16>}, {transform_indices = @transform_1, window_bounds = array<i64: 2, 16, 4>}]} {
    %c0 = arith.constant 0 : index
    %c0_0 = arith.constant 0 : index
    %c0_1 = arith.constant 0 : index
    %0 = vector.load %arg3[%c0, %c0_0, %c0_1] : memref<2x4x16xf32, #tpu.memory_space<vmem>>, vector<2x4x16xf32>
    %1 = tpu.transpose %0, [0, 2, 1] : vector<2x4x16xf32> -> vector<2x16x4xf32>
    %c0_2 = arith.constant 0 : index
    %c0_3 = arith.constant 0 : index
    %c0_4 = arith.constant 0 : index
    %2 = vector.load %arg4[%c0_2, %c0_3, %c0_4] : memref<2x16x4xf32, #tpu.memory_space<vmem>>, vector<2x16x4xf32>
    tpu.vector_store %arg4[%c0_2, %c0_3, %c0_4], %1 {strides = array<i32>} : memref<2x16x4xf32, #tpu.memory_space<vmem>>, vector<2x16x4xf32>,
    return
  }
  func.func @transform_0(%arg0: i32, %arg1: i32, %arg2: i32) -> (i32, i32, i32) {
    %c0_i32 = arith.constant 0 : i32
    return %arg0, %arg2, %arg1 : i32, i32, i32
  }
  func.func @transform_1(%arg0: i32, %arg1: i32, %arg2: i32) -> (i32, i32, i32) {
    %c0_i32 = arith.constant 0 : i32
    return %arg0, %arg1, %arg2 : i32, i32, i32
  }
}

</mosaic_0001>

<bundles_post_ra>
// kernel: tpu_custom_call.1
= control target key start
LH: loop header
LB: loop body
LE: loop exit
PB: predicated region body
PF: predicated region fallthrough
CT: control target
= control target key end

     0   :  { %6 = vsyncpa [#allocation3], 0  ;;  %s126_s6 = smov [#allocation2]   ;;  %s163_s0 = inlined_call_operand.hbm [shape: f32[2,4,16], index: 0, kind: input, shape index: {}]   ;;  %s164_s1 = inlined_call_operand.vmem [shape: f32[2,16,4], index: 1, kind: output, shape index: {}]  }
   0x1   :  { %s12_s7 = sshll.u32 %s126_s6, 4  ;;  %s102_s10 = scalar_lea.hbm %s163_s0, 128  ;;  %s13_s7 = int_to_ptr.vmem [resolvable:$true] %s12_s7 }
   0x2   :  { %p103_p0 = scmp.ne.s32.totalorder %s163_s0, %s102_s10  ;;  %p106_p1 = scmp.lt.u32.totalorder %s102_s10, %s163_s0 }
   0x4   :  { %p108_p2 = pnand %p106_p1, %p103_p0 }
   0x6   :  { %111 = shalt.err (!%p108_p2)
}
   0x7   :  { %s112_s15 = scalar_lea.vmem %s13_s7, 128  ;;  %p117_p4 = scmp.lt.s32.totalorder %s13_s7, %s13_s7 }
   0x8   :  { %p113_p3 = scmp.ne.s32.totalorder %s13_s7, %s112_s15  ;;  %p118_p5 = scmp.lt.s32.totalorder %s112_s15, %s112_s15 }
   0xa   :  { %p119_p6 = por %p118_p5, %p117_p4 }
   0xc   :  { %p120_p7 = pnand %p119_p6, %p113_p3 }
   0xe   :  { %123 = shalt.err (!%p120_p7)
}
   0xf   :  { %s127_s16 = smov 64   ;;  %s128_s17 = smov 4  }
  0x10   :  { %18 = dma.hbm_to_vmem [thread:$0]  %s163_s0, 128, %s13_s7, [#allocation3], %s127_s16, %s127_s16, %s128_s17  }
  0x11   :  { %124 = dma.done.wait [#allocation3], 128  }
  0x12   :  { %125 = vsyncadd [#allocation3], 4294967168  ;;  %v22_v0 = vld [vmem:[#allocation2] sm:$0xf]  ;;  %v23_v1 = vld [vmem:[#allocation2 + $0x4] sm:$0xf] }
  0x13   :  { %24 = vxpose.xlu0.b32.start.end [1/1] (short) (narrow) %v22_v0, 16  ;;  %vm88_vm0 = vcmask 31744  }
  0x18   :  { %56 = vxpose.xlu0.b32.start.end [1/1] (short) (narrow) %v23_v1, 16 }
  0x93   :  { %v40_v2 = vpop.trf.xlu0 }
  0x94   :  { %89 = vst.msk [vmem:[%s164_s1] sm:$0xff] %vm88_vm0, %v40_v2 }
  0x97   :  { %v41_v3 = vpop.trf.xlu0 }
  0x98   :  { %90 = vst.msk [vmem:[%s164_s1 + $0x8] sm:$0xff] %vm88_vm0, %v41_v3 }
  0x9b   :  { %v72_v4 = vpop.trf.xlu0 }
  0x9c   :  { %91 = vst.msk [vmem:[%s164_s1 + $0x10] sm:$0xff] %vm88_vm0, %v72_v4 }
  0x9f   :  { %v73_v5 = vpop.trf.xlu0 }
  0xa0   :  { %92 = vst.msk [vmem:[%s164_s1 + $0x18] sm:$0xff] %vm88_vm0, %v73_v5 }
  0xa1   :  { %97 = vsyncpa [#allocation3], 1 }

</bundles_post_ra>
